<compile_context>
chip_gen: v6e
topology: v6e:2x2x1
jax: 0.10.0
libtpu: 0.0.40
codegen_flags: <defaults>
</compile_context>

<pallas_src>
import functools

import jax
import jax.numpy as jnp
from jax.experimental import pallas as pl
from jax.experimental.pallas import tpu as pltpu

_THRESHOLD = 0.5  # the reference module hard-codes 0.5


def _sum11(a):
    # Full reduction kept as a (1, 1) vector: lane reduce, then sublane reduce.
    return jnp.sum(jnp.sum(a, axis=1, keepdims=True), axis=0, keepdims=True)


def _max11(a):
    return jnp.max(jnp.max(a, axis=1, keepdims=True), axis=0, keepdims=True)


def _build_kernel(scale_y, scale_x):
    def kernel(img_ref, out_ref):
        img = img_ref[...]                                   # (Hp, Wp) f32
        hp, wp = img.shape

        row = jax.lax.broadcasted_iota(jnp.int32, (hp, wp), 0).astype(jnp.float32)
        col = jax.lax.broadcasted_iota(jnp.int32, (hp, wp), 1).astype(jnp.float32)
        y = row * scale_y        # torch.linspace(0, 1, H) along rows (orig H)
        x = col * scale_x        # torch.linspace(0, 2, W) along cols (orig W)

        maskf = (img >= _THRESHOLD).astype(jnp.float32)      # padded pixels -> 0

        # TODO(synk): for very large tiles the three masked sums below could be
        # fused into one MXU dot against a ones vector to move the cross-lane
        # reductions off the XLU; kept as jnp.sum for lowering robustness here.
        cnt = _sum11(maskf)                                  # (1, 1)
        sum_y = _sum11(y * maskf)                            # (1, 1)
        sum_x = _sum11(x * maskf)                            # (1, 1)

        inv_cnt = jnp.where(cnt > 0.0, pl.reciprocal(cnt, approx=True), 0.0)
        mean_y = sum_y * inv_cnt                             # (1, 1)
        mean_x = sum_x * inv_cnt                             # (1, 1)

        cy = y - mean_y                                      # (Hp, Wp)
        cx = x - mean_x                                      # (Hp, Wp)

        # max over selected points of the *squared* norm; one rsqrt total.
        max_sq = _max11((cy * cy + cx * cx) * maskf)         # (1, 1)
        scale = jnp.where(max_sq > 0.0, jax.lax.rsqrt(max_sq), 1.0)

        out_ref[0, :, :] = cy * scale
        out_ref[1, :, :] = cx * scale

    return kernel


def _run_kernel(img_padded, h, w):
    hp, wp = img_padded.shape
    scale_y = 1.0 / max(h - 1, 1)          # torch.linspace(0, 1, H)
    scale_x = 2.0 / max(w - 1, 1)          # torch.linspace(0, 2, W)

    plane_bytes = hp * wp * 4
    cp = dict(dimension_semantics=("arbitrary",))
    # ~ img (2 buffers) + packed out (2 planes x 2 buffers) + ~8 temporaries.
    vmem_need = 16 * plane_bytes
    if vmem_need > (32 << 20):
        # TODO(synk): on v7x (64 MiB VMEM) very large images should switch to a
        # tiled multi-pass kernel (and a parallel batch axis for the 2 TCs)
        # instead of one whole-image block with a raised VMEM limit.
        cp["vmem_limit_bytes"] = int(min(vmem_need, 100 << 20))

    return pl.pallas_call(
        _build_kernel(scale_y, scale_x),
        grid=(1,),
        in_specs=[pl.BlockSpec((hp, wp), lambda i: (0, 0))],
        out_specs=pl.BlockSpec((2, hp, wp), lambda i: (0, 0, 0)),
        out_shape=jax.ShapeDtypeStruct((2, hp, wp), jnp.float32),
        compiler_params=pltpu.CompilerParams(**cp),
    )(img_padded)


@functools.partial(jax.jit, static_argnames=("n_points",))
def _to_point_cloud_impl(image, key, n_points):
    img = image[0].astype(jnp.float32)
    h, w = img.shape

    # Pad to a sublane/lane-aligned plane; padded pixels are 0 < threshold, so
    # they never enter the mask (original H/W still drive the coordinate scales).
    hp = max(8, -(-h // 8) * 8)
    wp = max(128, -(-w // 128) * 128)
    img_p = jnp.pad(img, ((0, hp - h), (0, wp - w)))

    pc = _run_kernel(img_p, h, w)                  # (2, hp, wp): [pcy, pcx]
    pts = pc.reshape(2, -1).T                      # (hp*wp, 2), row-major pixels

    mask_flat = (img_p >= _THRESHOLD).reshape(-1)  # recomputed here; fused by XLA
    count = jnp.sum(mask_flat, dtype=jnp.int32)

    n_flat = hp * wp
    # Single argsort over a fused priority key:
    #   selected & count <= n_points -> deterministic row-major order (pad branch)
    #   selected & count >  n_points -> random order => uniform random subset
    #   unselected                   -> +inf (pushed to the end)
    # TODO(synk): torch.randperm subsampling replaced by JAX-PRNG random
    # priorities (same distribution family, not bit-identical randomness).
    det_pri = jnp.arange(n_flat, dtype=jnp.float32) * (1.0 / n_flat)
    rand_pri = jax.random.uniform(key, (n_flat,), dtype=jnp.float32)
    pri = jnp.where(mask_flat,
                    jnp.where(count > n_points, rand_pri, det_pri),
                    jnp.inf)
    order = jnp.argsort(pri, stable=True)
    pts_sorted = pts[order]                        # (hp*wp, 2)

    idx = jnp.arange(n_points)
    gather_idx = jnp.where(idx < count, jnp.minimum(idx, n_flat - 1), 0)
    return pts_sorted[gather_idx]                  # (n_points, 2)


def to_point_cloud(image, n_points=256, key=None, validate=False):
    """image: (1, H, W) float32 in [0, 1]  ->  (n_points, 2) float32."""
    assert image.ndim == 3 and image.shape[0] == 1, "expected image of shape (1, H, W)"
    if validate:
        # Matches the reference ValueError, but forces a device->host sync and
        # breaks under jit, so it is off by default.
        if not bool(jnp.all((image >= 0.0) & (image <= 1.0))):
            raise ValueError("Only support pixel values in [0, 1]")
    if key is None:
        key = jax.random.PRNGKey(0)
    return _to_point_cloud_impl(image, key, n_points=n_points)


if __name__ == "__main__":
    root = jax.random.PRNGKey(0)
    k_img1, k_img2, k_sub = jax.random.split(root, 3)

    # Small image: ~128 of 256 pixels >= 0.5 -> pad-with-first-point branch.
    image1 = jax.random.uniform(k_img1, (1, 16, 16), dtype=jnp.float32)
    pc1 = to_point_cloud(image1, n_points=256, key=k_sub)
    jax.block_until_ready(pc1)
    assert pc1.shape == (256, 2) and pc1.dtype == jnp.float32
    assert bool(jnp.all(jnp.isfinite(pc1)))

    # Non-lane-aligned image: ~640 of 1280 pixels >= 0.5 -> random subsample branch.
    image2 = jax.random.uniform(k_img2, (1, 32, 40), dtype=jnp.float32)
    pc2 = to_point_cloud(image2, n_points=256, key=k_sub)
    jax.block_until_ready(pc2)
    assert pc2.shape == (256, 2) and pc2.dtype == jnp.float32
    assert bool(jnp.all(jnp.isfinite(pc2)))

    print("KERNEL_OK")
</pallas_src>

<mosaic_0001>
module attributes {stable_mosaic.version = 11 : i64} {
  func.func @kernel(%arg0: i32, %arg1: memref<16x128xf32, #tpu.memory_space<vmem>>, %arg2: memref<2x16x128xf32, #tpu.memory_space<vmem>>) attributes {dimension_semantics = [#tpu.dimension_semantics<arbitrary>], iteration_bounds = array<i64: 1>, scalar_prefetch = 0 : i64, scratch_operands = 0 : i64, tpu.core_type = #tpu.core_type<tc>, window_params = [{pipeline_mode = #tpu.pipeline_mode<synchronous>, transform_indices = @transform_0, window_bounds = array<i64: 16, 128>}, {pipeline_mode = #tpu.pipeline_mode<synchronous>, transform_indices = @transform_1, window_bounds = array<i64: 2, 16, 128>}]} {
    %c0 = arith.constant 0 : index
    %c0_0 = arith.constant 0 : index
    %0 = vector.load %arg1[%c0, %c0_0] : memref<16x128xf32, #tpu.memory_space<vmem>>, vector<16x128xf32>
    %1 = tpu.iota {dimensions = array<i32: 0>} : vector<16x128xi32>
    %2 = arith.sitofp %1 : vector<16x128xi32> to vector<16x128xf32>
    %3 = tpu.iota {dimensions = array<i32: 1>} : vector<16x128xi32>
    %4 = arith.sitofp %3 : vector<16x128xi32> to vector<16x128xf32>
    %cst = arith.constant 0.0666666701 : f32
    %5 = vector.broadcast %cst : f32 to vector<16x128xf32>
    %6 = arith.mulf %2, %5 : vector<16x128xf32>
    %cst_1 = arith.constant 0.13333334 : f32
    %7 = vector.broadcast %cst_1 : f32 to vector<16x128xf32>
    %8 = arith.mulf %4, %7 : vector<16x128xf32>
    %cst_2 = arith.constant 5.000000e-01 : f32
    %9 = vector.broadcast %cst_2 : f32 to vector<16x128xf32>
    %10 = arith.cmpf oge, %0, %9 : vector<16x128xf32>
    %11 = arith.extui %10 : vector<16x128xi1> to vector<16x128xi32>
    %12 = arith.sitofp %11 : vector<16x128xi32> to vector<16x128xf32>
    %cst_3 = arith.constant dense<0.000000e+00> : vector<16xf32>
    %13 = vector.multi_reduction <add>, %12, %cst_3 [1] : vector<16x128xf32> to vector<16xf32>
    %14 = vector.shape_cast %13 : vector<16xf32> to vector<16x1xf32>
    %cst_4 = arith.constant dense<0.000000e+00> : vector<1xf32>
    %15 = vector.multi_reduction <add>, %14, %cst_4 [0] : vector<16x1xf32> to vector<1xf32>
    %16 = vector.shape_cast %15 : vector<1xf32> to vector<1x1xf32>
    %17 = arith.mulf %6, %12 : vector<16x128xf32>
    %cst_5 = arith.constant dense<0.000000e+00> : vector<16xf32>
    %18 = vector.multi_reduction <add>, %17, %cst_5 [1] : vector<16x128xf32> to vector<16xf32>
    %19 = vector.shape_cast %18 : vector<16xf32> to vector<16x1xf32>
    %cst_6 = arith.constant dense<0.000000e+00> : vector<1xf32>
    %20 = vector.multi_reduction <add>, %19, %cst_6 [0] : vector<16x1xf32> to vector<1xf32>
    %21 = vector.shape_cast %20 : vector<1xf32> to vector<1x1xf32>
    %22 = arith.mulf %8, %12 : vector<16x128xf32>
    %cst_7 = arith.constant dense<0.000000e+00> : vector<16xf32>
    %23 = vector.multi_reduction <add>, %22, %cst_7 [1] : vector<16x128xf32> to vector<16xf32>
    %24 = vector.shape_cast %23 : vector<16xf32> to vector<16x1xf32>
    %cst_8 = arith.constant dense<0.000000e+00> : vector<1xf32>
    %25 = vector.multi_reduction <add>, %24, %cst_8 [0] : vector<16x1xf32> to vector<1xf32>
    %26 = vector.shape_cast %25 : vector<1xf32> to vector<1x1xf32>
    %cst_9 = arith.constant 0.000000e+00 : f32
    %27 = vector.broadcast %cst_9 : f32 to vector<1x1xf32>
    %28 = arith.cmpf ogt, %16, %27 : vector<1x1xf32>
    %29 = tpu.reciprocal %16 {approx = true} : vector<1x1xf32> -> vector<1x1xf32>
    %cst_10 = arith.constant 0.000000e+00 : f32
    %30 = vector.broadcast %cst_10 : f32 to vector<1x1xf32>
    %31 = arith.select %28, %29, %30 : vector<1x1xi1>, vector<1x1xf32>
    %32 = arith.mulf %21, %31 : vector<1x1xf32>
    %33 = arith.mulf %26, %31 : vector<1x1xf32>
    %34 = vector.broadcast %32 : vector<1x1xf32> to vector<16x128xf32>
    %35 = arith.subf %6, %34 : vector<16x128xf32>
    %36 = vector.broadcast %33 : vector<1x1xf32> to vector<16x128xf32>
    %37 = arith.subf %8, %36 : vector<16x128xf32>
    %38 = arith.mulf %35, %35 : vector<16x128xf32>
    %39 = arith.mulf %37, %37 : vector<16x128xf32>
    %40 = arith.addf %38, %39 : vector<16x128xf32>
    %41 = arith.mulf %40, %12 : vector<16x128xf32>
    %cst_11 = arith.constant dense<0xFF800000> : vector<16xf32>
    %42 = vector.multi_reduction <maximumf>, %41, %cst_11 [1] : vector<16x128xf32> to vector<16xf32>
    %43 = vector.shape_cast %42 : vector<16xf32> to vector<16x1xf32>
    %cst_12 = arith.constant dense<0xFF800000> : vector<1xf32>
    %44 = vector.multi_reduction <maximumf>, %43, %cst_12 [0] : vector<16x1xf32> to vector<1xf32>
    %45 = vector.shape_cast %44 : vector<1xf32> to vector<1x1xf32>
    %cst_13 = arith.constant 0.000000e+00 : f32
    %46 = vector.broadcast %cst_13 : f32 to vector<1x1xf32>
    %47 = arith.cmpf ogt, %45, %46 : vector<1x1xf32>
    %48 = math.rsqrt %45 : vector<1x1xf32>
    %cst_14 = arith.constant 1.000000e+00 : f32
    %49 = vector.broadcast %cst_14 : f32 to vector<1x1xf32>
    %50 = arith.select %47, %48, %49 : vector<1x1xi1>, vector<1x1xf32>
    %51 = vector.broadcast %50 : vector<1x1xf32> to vector<16x128xf32>
    %52 = arith.mulf %35, %51 : vector<16x128xf32>
    %c0_15 = arith.constant 0 : index
    %c0_16 = arith.constant 0 : index
    %c0_17 = arith.constant 0 : index
    %53 = vector.load %arg2[%c0_15, %c0_16, %c0_17] : memref<2x16x128xf32, #tpu.memory_space<vmem>>, vector<1x16x128xf32>
    %54 = vector.shape_cast %53 : vector<1x16x128xf32> to vector<16x128xf32>
    %55 = vector.shape_cast %52 : vector<16x128xf32> to vector<1x16x128xf32>
    tpu.vector_store %arg2[%c0_15, %c0_16, %c0_17], %55 {strides = array<i32>} : memref<2x16x128xf32, #tpu.memory_space<vmem>>, vector<1x16x128xf32>,
    %56 = vector.broadcast %50 : vector<1x1xf32> to vector<16x128xf32>
    %57 = arith.mulf %37, %56 : vector<16x128xf32>
    %c1 = arith.constant 1 : index
    %c0_18 = arith.constant 0 : index
    %c0_19 = arith.constant 0 : index
    %58 = vector.load %arg2[%c1, %c0_18, %c0_19] : memref<2x16x128xf32, #tpu.memory_space<vmem>>, vector<1x16x128xf32>
    %59 = vector.shape_cast %58 : vector<1x16x128xf32> to vector<16x128xf32>
    %60 = vector.shape_cast %57 : vector<16x128xf32> to vector<1x16x128xf32>
    tpu.vector_store %arg2[%c1, %c0_18, %c0_19], %60 {strides = array<i32>} : memref<2x16x128xf32, #tpu.memory_space<vmem>>, vector<1x16x128xf32>,
    return
  }
  func.func @transform_0(%arg0: i32) -> (i32, i32) {
    %c0_i32 = arith.constant 0 : i32
    %c0_i32_0 = arith.constant 0 : i32
    %c0_i32_1 = arith.constant 0 : i32
    return %c0_i32, %c0_i32_0 : i32, i32
  }
  func.func @transform_1(%arg0: i32) -> (i32, i32, i32) {
    %c0_i32 = arith.constant 0 : i32
    %c0_i32_0 = arith.constant 0 : i32
    %c0_i32_1 = arith.constant 0 : i32
    %c0_i32_2 = arith.constant 0 : i32
    return %c0_i32, %c0_i32_0, %c0_i32_1 : i32, i32, i32
  }
}

</mosaic_0001>

<bundles_post_ra>
// kernel: _to_point_cloud_impl.1
= control target key start
LH: loop header
LB: loop body
LE: loop exit
PB: predicated region body
PF: predicated region fallthrough
CT: control target
= control target key end

     0   :  { %v10_v0 = vlaneseq  ;;  %v114_v5 = vmov 0.0   ;;  %s143_s0 = inlined_call_operand.vmem [shape: f32[16,128], index: 0, kind: input, shape index: {}]   ;;  %s144_s1 = inlined_call_operand.vmem [shape: f32[2,16,128], index: 1, kind: output, shape index: {}]  }
   0x1   :  { %v8_v1 = vld [vmem:[%s143_s0] sm:$0xff]  ;;  %v9_v2 = vld [vmem:[%s143_s0 + $0x8] sm:$0xff] }
   0x2   :  { %vm21_vm0 = vcmp.ge.f32.partialorder %v8_v1, 0.5  ;;  %vm22_vm1 = vcmp.ge.f32.partialorder %v9_v2, 0.5  ;;  %v11_v3 = vshrl.u32 %v10_v0, 7  ;;  %v16_v4 = vand.u32 127, %v10_v0 }
   0x3   :  { %v105_v6 = vsel %vm21_vm0, 1.0, %v114_v5  ;;  %v106_v10 = vsel %vm22_vm1, 1.0, %v114_v5 }
   0x4   :  { %27 = vadd.xlane.f32.xlu0 %v105_v6  ;;  %v13_v7 = vcvt.s32.f32 %v11_v3  ;;  %v12_v8 = vadd.s32 8, %v11_v3  ;;  %v17_v9 = vcvt.s32.f32 %v16_v4 }
   0x6   :  { %v18_v11 = vmul.f32 0.06666667, %v13_v7  ;;  %v14_v12 = vcvt.s32.f32 %v12_v8  ;;  %v20_v13 = vmul.f32 0.13333334, %v17_v9 }
   0x8   :  { %29 = vadd.xlane.f32.xlu0 %v106_v10  ;;  %v38_v14 = vmul.f32 %v105_v6, %v18_v11  ;;  %v19_v15 = vmul.f32 0.06666667, %v14_v12  ;;  %v51_v16 = vmul.f32 %v105_v6, %v20_v13  ;;  %v52_v18 = vmul.f32 %v106_v10, %v20_v13 }
   0xa   :  { %40 = vadd.xlane.f32.xlu1 %v38_v14  ;;  %v39_v17 = vmul.f32 %v106_v10, %v19_v15 }
   0xc   :  { %53 = vadd.xlane.f32.xlu0 %v51_v16 }
   0xe   :  { %42 = vadd.xlane.f32.xlu1 %v39_v17 }
  0x12   :  { %55 = vadd.xlane.f32.xlu1 %v52_v18 }
  0x8d   :  { %v28_v19 = vpop.xlane.xlu0 %27 }
  0x91   :  { %v30_v20 = vpop.xlane.xlu0 %29 }
  0x92   :  { %v31_v21 = vadd.f32 %v30_v20, %v28_v19 }
  0x93   :  { %v41_v22 = vpop.xlane.xlu1 %40 }
  0x94   :  { %v32_v23 = vrot.slane %v31_v21, 4 }
  0x95   :  { %v54_v28 = vpop.xlane.xlu0 %53 }
  0x96   :  { %v33_v24 = vadd.f32 %v32_v23, %v31_v21 }
  0x97   :  { %v43_v25 = vpop.xlane.xlu1 %42 }
  0x98   :  { %v34_v26 = vrot.slane %v33_v24, 2  ;;  %v44_v27 = vadd.f32 %v43_v25, %v41_v22 }
  0x9a   :  { %v35_v29 = vadd.f32 %v34_v26, %v33_v24  ;;  %v45_v30 = vrot.slane %v44_v27, 4 }
  0x9b   :  { %v56_v31 = vpop.xlane.xlu1 %55 }
  0x9c   :  { %v36_v32 = vrot.slane %v35_v29, 1  ;;  %v57_v33 = vadd.f32 %v56_v31, %v54_v28  ;;  %v46_v34 = vadd.f32 %v45_v30, %v44_v27 }
  0x9e   :  { %v37_v35 = vadd.f32 %v36_v32, %v35_v29  ;;  %v58_v36 = vrot.slane %v57_v33, 4  ;;  %v47_v38 = vrot.slane %v46_v34, 2 }
  0xa0   :  { %110 = vrcp.f32 %v37_v35  ;;  %v59_v37 = vadd.f32 %v58_v36, %v57_v33  ;;  %v48_v40 = vadd.f32 %v47_v38, %v46_v34  ;;  %vm64_vm2 = vcmp.gt.f32.partialorder %v37_v35, 0.0 }
  0xa2   :  { %v60_v39 = vrot.slane %v59_v37, 2  ;;  %v49_v42 = vrot.slane %v48_v40, 1 }
  0xa4   :  { %v61_v41 = vadd.f32 %v60_v39, %v59_v37  ;;  %v50_v45 = vadd.f32 %v49_v42, %v48_v40 }
  0xa6   :  { %v62_v43 = vrot.slane %v61_v41, 1 }
  0xa8   :  { %v63_v46 = vadd.f32 %v62_v43, %v61_v41 }
  0xad   :  { %v111_v44 = vpop.eup %110 }
  0xae   :  { %v66_v47 = vsel %vm64_vm2, %v111_v44, 0.0 }
  0xaf   :  { %v67_v48 = vmul.f32 %v66_v47, %v50_v45  ;;  %v68_v49 = vmul.f32 %v66_v47, %v63_v46 }
  0xb1   :  { %v70_v50 = vsub.f32 %v19_v15, %v67_v48  ;;  %v71_v51 = vsub.f32 %v20_v13, %v68_v49  ;;  %v69_v52 = vsub.f32 %v18_v11, %v67_v48 }
  0xb3   :  { %v73_v53 = vmul.f32 %v70_v50, %v70_v50  ;;  %v74_v54 = vmul.f32 %v71_v51, %v71_v51  ;;  %v72_v55 = vmul.f32 %v69_v52, %v69_v52 }
  0xb5   :  { %v76_v56 = vadd.f32 %v74_v54, %v73_v53  ;;  %v75_v57 = vadd.f32 %v74_v54, %v72_v55 }
  0xb7   :  { %v78_v58 = vmul.f32 %v106_v10, %v76_v56  ;;  %v77_v59 = vmul.f32 %v105_v6, %v75_v57 }
  0xb9   :  { %81 = vmax.xlane.f32.xlu1 %v78_v58  ;;  %79 = vmax.xlane.f32.xlu0 %v77_v59 }
 0x142   :  { %v82_v60 = vpop.xlane.xlu1 %81  ;;  %v80_v61 = vpop.xlane.xlu0 %79 }
 0x143   :  { %v83_v62 = vmax.f32 %v80_v61, %v82_v60 }
 0x145   :  { %v84_v63 = vrot.slane %v83_v62, 4 }
 0x147   :  { %v85_v0 = vmax.f32 %v83_v62, %v84_v63 }
 0x149   :  { %v86_v1 = vrot.slane %v85_v0, 2 }
 0x14b   :  { %v87_v2 = vmax.f32 %v85_v0, %v86_v1 }
 0x14d   :  { %v88_v3 = vrot.slane %v87_v2, 1 }
 0x14f   :  { %v89_v4 = vmax.f32 %v87_v2, %v88_v3 }
 0x151   :  { %112 = vrsqrt.f32 %v89_v4  ;;  %vm90_vm3 = vcmp.gt.f32.partialorder %v89_v4, 0.0 }
 0x15e   :  { %v113_v5 = vpop.eup %112 }
 0x15f   :  { %v92_v7 = vsel %vm90_vm3, %v113_v5, 1.0 }
 0x160   :  { %v93_v8 = vmul.f32 %v92_v7, %v69_v52  ;;  %v94_v9 = vmul.f32 %v92_v7, %v70_v50  ;;  %v97_v11 = vmul.f32 %v92_v7, %v71_v51 }
 0x162   :  { %95 = vst [vmem:[%s144_s1] sm:$0xff] %v93_v8  ;;  %96 = vst [vmem:[%s144_s1 + $0x8] sm:$0xff] %v94_v9 }
 0x163   :  { %107 = vst [vmem:[%s144_s1 + $0x10] sm:$0xff] %v97_v11  ;;  %108 = vst [vmem:[%s144_s1 + $0x18] sm:$0xff] %v97_v11 }

</bundles_post_ra>
